<compile_context>
chip_gen: v7x
topology: tpu7x:2x2x1
jax: 0.10.0
libtpu: 0.0.40
codegen_flags: <defaults>
</compile_context>

<pallas_src>
import math
from typing import NamedTuple

import jax
import jax.numpy as jnp
from jax.experimental import pallas as pl
from jax.experimental.pallas import tpu as pltpu


def _round_up(x, m):
    return ((x + m - 1) // m) * m


# ----------------------------- kernels ---------------------------------------

def _noisy_linear_kernel_acc(x_ref, wmu_ref, wsig_ref, ein_ref, bias_ref,
                             o_ref, acc_ref):
    """3-D grid (B, O, K) variant with f32 VMEM accumulator over K."""
    k = pl.program_id(2)

    @pl.when(k == 0)
    def _init():
        acc_ref[...] = jnp.zeros_like(acc_ref)

    # Rebuild the noisy weight tile in VMEM from the FACTORIZED noise.
    # eps_out was folded into wsig at reset time, so:
    #   W = weight_mu + (weight_sigma * eps_out[:, None]) * eps_in[None, :]
    # ein_ref is a (1, TI) row -> cheap sublane broadcast on the VPU.
    w = wmu_ref[...] + wsig_ref[...] * ein_ref[...]

    # (TB, TI) · (TO, TI) contracted on the last dim of each -> (TB, TO);
    # bf16 operands, f32 MXU accumulation, no weight transpose in-kernel.
    acc_ref[...] += jax.lax.dot_general(
        x_ref[...], w,
        dimension_numbers=(((1,), (1,)), ((), ())),
        preferred_element_type=jnp.float32)

    @pl.when(k == pl.num_programs(2) - 1)
    def _finalize():
        o_ref[...] = (acc_ref[...] + bias_ref[...]).astype(o_ref.dtype)


def _noisy_linear_kernel_single(x_ref, wmu_ref, wsig_ref, ein_ref, bias_ref,
                                o_ref):
    """2-D grid (B, O) variant: whole reduction in one K block, no scratch."""
    w = wmu_ref[...] + wsig_ref[...] * ein_ref[...]
    acc = jax.lax.dot_general(
        x_ref[...], w,
        dimension_numbers=(((1,), (1,)), ((), ())),
        preferred_element_type=jnp.float32)
    o_ref[...] = (acc + bias_ref[...]).astype(o_ref.dtype)


# --------------------- once-per-noise-reset preparation -----------------------

class NoisyLinearCache(NamedTuple):
    wmu: jax.Array        # (Op, Ip) compute_dtype, zero-padded weight_mu
    wsig_eout: jax.Array  # (Op, Ip) compute_dtype, weight_sigma * eps_out[:,None]
    ein: jax.Array        # (1, Ip)  compute_dtype, eps_in row
    bias: jax.Array       # (1, Op)  f32, bias_mu + bias_sigma * bias_epsilon
    out_features: int
    in_features: int
    to: int
    ti: int
    tb_max: int


def _default_tiles():
    """Generation-aware tile defaults: (tb_max, to, ti)."""
    try:
        kind = jax.devices()[0].device_kind.lower()
    except Exception:  # pragma: no cover - defensive
        kind = ""
    if "v5 lite" in kind or "v5e" in kind or "v5lite" in kind:
        # v5e: 16 MiB default scoped VMEM, ~0.8 TB/s HBM -> smaller O tile,
        # lean on bf16 weight storage instead of tile growth.
        return 512, 256, 1024
    # v6e / v7x (and default): 32 MiB scoped VMEM; ~10 MiB of bf16 buffers.
    return 512, 512, 1024


def prepare_noisy_linear(weight_mu, weight_sigma, eps_in, eps_out,
                         bias_mu, bias_sigma, bias_epsilon,
                         *, compute_dtype=jnp.bfloat16,
                         tb=None, to=None, ti=None):
    """Cache padded / fused parameters.  Call once per reset_noise().

    This is the per-noise-reset preprocessing hoisted out of forward():
      * zero-pad the two (O, I) weight matrices to tile multiples,
      * fold eps_out into weight_sigma,
      * fuse the three bias tensors into one (1, O) f32 row,
      * cast the weight streams to bf16 (halves HBM weight traffic; f32
        accumulation in the kernel keeps the matmul numerics tight).
    """
    O, I = weight_mu.shape
    tb_d, to_d, ti_d = _default_tiles()
    tb_max = tb if tb is not None else tb_d
    to = to if to is not None else to_d
    ti = ti if ti is not None else ti_d

    TO = min(to, _round_up(O, 128))
    TI = min(ti, _round_up(I, 128))
    Op, Ip = _round_up(O, TO), _round_up(I, TI)

    # Give dual-TensorCore chips (v7x) >= 2 blocks on the parallel O axis when
    # it does not increase padding (weight HBM traffic is unchanged by this).
    if Op // TO == 1 and TO >= 256:
        to_split = _round_up(pl.cdiv(Op, 2), 128)
        if _round_up(O, to_split) == Op:
            TO = to_split

    wmu = jnp.pad(weight_mu, ((0, Op - O), (0, Ip - I))).astype(compute_dtype)
    # Fold eps_out into weight_sigma (once per reset; free at forward time).
    wsig = weight_sigma * eps_out[:, None]
    wsig = jnp.pad(wsig, ((0, Op - O), (0, Ip - I))).astype(compute_dtype)
    ein = jnp.pad(eps_in, (0, Ip - I)).astype(compute_dtype).reshape(1, Ip)
    bias = (bias_mu + bias_sigma * bias_epsilon).astype(jnp.float32)
    bias = jnp.pad(bias, (0, Op - O)).reshape(1, Op)

    return NoisyLinearCache(wmu=wmu, wsig_eout=wsig, ein=ein, bias=bias,
                            out_features=O, in_features=I,
                            to=TO, ti=TI, tb_max=tb_max)


# ------------------------------ forward ---------------------------------------

def noisy_linear_forward(x, cache: NoisyLinearCache):
    """NoisyLinear forward using the cached (per-noise-reset) parameters.

    x: (B, I) in any float dtype; returns (B, O) in x.dtype.
    """
    B, I = x.shape
    O = cache.out_features
    assert I == cache.in_features, "input feature mismatch"
    Op, Ip = cache.wmu.shape
    TO, TI = cache.to, cache.ti
    out_dtype = x.dtype
    compute_dtype = cache.wmu.dtype

    # Whole batch in one block whenever it fits (<= tb_max): weights then
    # stream from HBM exactly once per forward.
    TB = min(cache.tb_max, _round_up(B, 8))
    Bp = _round_up(B, TB)

    xp = x
    if (Bp, Ip) != (B, I):
        xp = jnp.pad(x, ((0, Bp - B), (0, Ip - I)))
    xp = xp.astype(compute_dtype)

    grid_b, grid_o, grid_k = Bp // TB, Op // TO, Ip // TI

    # Advisory cost: x re-streamed per O block, weights per batch block.
    bytes_accessed = (
        xp.size * xp.dtype.itemsize * grid_o
        + (cache.wmu.size + cache.wsig_eout.size) * cache.wmu.dtype.itemsize * grid_b
        + cache.ein.size * cache.ein.dtype.itemsize * grid_b * grid_o
        + cache.bias.size * cache.bias.dtype.itemsize * grid_b
        + Bp * Op * jnp.dtype(out_dtype).itemsize)
    cost = pl.CostEstimate(flops=2 * Bp * Op * Ip, transcendentals=0,
                           bytes_accessed=bytes_accessed)

    if grid_k == 1:
        # Common NoisyNet case (I <= TI): no accumulator scratch needed.
        out = pl.pallas_call(
            _noisy_linear_kernel_single,
            out_shape=jax.ShapeDtypeStruct((Bp, Op), out_dtype),
            grid_spec=pltpu.PrefetchScalarGridSpec(
                num_scalar_prefetch=0,
                grid=(grid_b, grid_o),
                in_specs=[
                    pl.BlockSpec((TB, TI), lambda i, j: (i, 0)),   # x
                    pl.BlockSpec((TO, TI), lambda i, j: (j, 0)),   # weight_mu
                    pl.BlockSpec((TO, TI), lambda i, j: (j, 0)),   # sigma*eps_out
                    pl.BlockSpec((1, TI),  lambda i, j: (0, 0)),   # eps_in row
                    pl.BlockSpec((1, TO),  lambda i, j: (0, j)),   # fused bias
                ],
                out_specs=pl.BlockSpec((TB, TO), lambda i, j: (i, j)),
            ),
            compiler_params=pltpu.CompilerParams(
                dimension_semantics=("parallel", "parallel")),
            cost_estimate=cost,
        )(xp, cache.wmu, cache.wsig_eout, cache.ein, cache.bias)
    else:
        out = pl.pallas_call(
            _noisy_linear_kernel_acc,
            out_shape=jax.ShapeDtypeStruct((Bp, Op), out_dtype),
            grid_spec=pltpu.PrefetchScalarGridSpec(
                num_scalar_prefetch=0,
                grid=(grid_b, grid_o, grid_k),
                in_specs=[
                    pl.BlockSpec((TB, TI), lambda i, j, k: (i, k)),   # x
                    pl.BlockSpec((TO, TI), lambda i, j, k: (j, k)),   # weight_mu
                    pl.BlockSpec((TO, TI), lambda i, j, k: (j, k)),   # sigma*eps_out
                    pl.BlockSpec((1, TI),  lambda i, j, k: (0, k)),   # eps_in row
                    pl.BlockSpec((1, TO),  lambda i, j, k: (0, j)),   # fused bias
                ],
                out_specs=pl.BlockSpec((TB, TO), lambda i, j, k: (i, j)),
                scratch_shapes=[pltpu.VMEM((TB, TO), jnp.float32)],
            ),
            compiler_params=pltpu.CompilerParams(
                dimension_semantics=("parallel", "parallel", "arbitrary")),
            cost_estimate=cost,
        )(xp, cache.wmu, cache.wsig_eout, cache.ein, cache.bias)

    if (Bp, Op) != (B, O):
        out = out[:B, :O]
    return out


# ------------- parameter / noise construction (plain JAX glue) ---------------

def scale_noise(key, size):
    """Factorized gaussian noise scaling: sign(x) * sqrt(|x|)."""
    x = jax.random.normal(key, (size,), dtype=jnp.float32)
    return jnp.sign(x) * jnp.sqrt(jnp.abs(x))


def init_noisy_linear_params(key, in_features, out_features, std_init=0.5):
    k_wmu, k_bmu, k_ein, k_eout = jax.random.split(key, 4)
    mu_range = 1.0 / math.sqrt(in_features)

    weight_mu = jax.random.uniform(
        k_wmu, (out_features, in_features), jnp.float32, -mu_range, mu_range)
    weight_sigma = jnp.full((out_features, in_features),
                            std_init / math.sqrt(in_features), jnp.float32)
    bias_mu = jax.random.uniform(
        k_bmu, (out_features,), jnp.float32, -mu_range, mu_range)
    bias_sigma = jnp.full((out_features,),
                          std_init / math.sqrt(out_features), jnp.float32)

    # reset_noise(): keep the noise FACTORIZED; weight_epsilon is implied as
    # outer(eps_out, eps_in) and is rebuilt tile-wise inside the kernel.
    eps_in = scale_noise(k_ein, in_features)
    eps_out = scale_noise(k_eout, out_features)
    bias_epsilon = eps_out

    return (weight_mu, weight_sigma, eps_in, eps_out,
            bias_mu, bias_sigma, bias_epsilon)


def noisy_linear_ref(x, weight_mu, weight_sigma, eps_in, eps_out,
                     bias_mu, bias_sigma, bias_epsilon):
    """f32 reference matching the PyTorch module exactly (full epsilon buffer)."""
    weight_epsilon = jnp.outer(eps_out, eps_in)
    w = weight_mu + weight_sigma * weight_epsilon
    b = bias_mu + bias_sigma * bias_epsilon
    return x @ w.T + b


if __name__ == "__main__":
    key = jax.random.PRNGKey(0)
    k_param, k_x = jax.random.split(key)

    batch, in_features, out_features = 8, 32, 32
    params = init_noisy_linear_params(k_param, in_features, out_features)

    # Once per reset_noise(): pad / fuse / cast and cache.
    cache = prepare_noisy_linear(*params)

    x = jax.random.normal(k_x, (batch, in_features), dtype=jnp.float32)

    out = noisy_linear_forward(x, cache)
    out = jax.block_until_ready(out)

    ref = noisy_linear_ref(x, *params)
    assert out.shape == (batch, out_features)
    # bf16 MXU operands (f32 accumulation) vs. the f32 reference -> loose tol.
    max_err = float(jnp.max(jnp.abs(out - ref)))
    assert jnp.allclose(out, ref, atol=3e-2, rtol=3e-2), \
        f"mismatch vs reference (max abs err {max_err})"

    print("KERNEL_OK")
</pallas_src>

<mosaic_0001>
module attributes {stable_mosaic.version = 11 : i64} {
  func.func @_noisy_linear_kernel_single(%arg0: i32, %arg1: i32, %arg2: memref<8x128xbf16, #tpu.memory_space<vmem>>, %arg3: memref<128x128xbf16, #tpu.memory_space<vmem>>, %arg4: memref<128x128xbf16, #tpu.memory_space<vmem>>, %arg5: memref<1x128xbf16, #tpu.memory_space<vmem>>, %arg6: memref<1x128xf32, #tpu.memory_space<vmem>>, %arg7: memref<8x128xf32, #tpu.memory_space<vmem>>) attributes {dimension_semantics = [#tpu.dimension_semantics<parallel>, #tpu.dimension_semantics<parallel>], iteration_bounds = array<i64: 1, 1>, scalar_prefetch = 0 : i64, scratch_operands = 0 : i64, tpu.core_type = #tpu.core_type<tc>, window_params = [{transform_indices = @transform_0, window_bounds = array<i64: 8, 128>}, {transform_indices = @transform_1, window_bounds = array<i64: 128, 128>}, {transform_indices = @transform_2, window_bounds = array<i64: 128, 128>}, {pipeline_mode = #tpu.pipeline_mode<synchronous>, transform_indices = @transform_3, window_bounds = array<i64: 1, 128>}, {transform_indices = @transform_4, window_bounds = array<i64: 1, 128>}, {transform_indices = @transform_5, window_bounds = array<i64: 8, 128>}]} {
    %c0 = arith.constant 0 : index
    %c0_0 = arith.constant 0 : index
    %0 = vector.load %arg3[%c0, %c0_0] : memref<128x128xbf16, #tpu.memory_space<vmem>>, vector<128x128xbf16>
    %c0_1 = arith.constant 0 : index
    %c0_2 = arith.constant 0 : index
    %1 = vector.load %arg4[%c0_1, %c0_2] : memref<128x128xbf16, #tpu.memory_space<vmem>>, vector<128x128xbf16>
    %c0_3 = arith.constant 0 : index
    %c0_4 = arith.constant 0 : index
    %2 = vector.load %arg5[%c0_3, %c0_4] : memref<1x128xbf16, #tpu.memory_space<vmem>>, vector<1x128xbf16>
    %3 = vector.broadcast %2 : vector<1x128xbf16> to vector<128x128xbf16>
    %4 = arith.mulf %1, %3 : vector<128x128xbf16>
    %5 = arith.addf %0, %4 : vector<128x128xbf16>
    %c0_5 = arith.constant 0 : index
    %c0_6 = arith.constant 0 : index
    %6 = vector.load %arg2[%c0_5, %c0_6] : memref<8x128xbf16, #tpu.memory_space<vmem>>, vector<8x128xbf16>
    %cst = arith.constant dense<0.000000e+00> : vector<8x128xf32>
    %7 = tpu.matmul %6, %5, %cst {dimension_numbers = #tpu.dot_dimension_numbers<[1], [1], [0], [0], [0, 0, 1, 0], [], []>} : vector<8x128xbf16>, vector<128x128xbf16>, vector<8x128xf32> -> vector<8x128xf32>
    %c0_7 = arith.constant 0 : index
    %c0_8 = arith.constant 0 : index
    %8 = vector.load %arg6[%c0_7, %c0_8] : memref<1x128xf32, #tpu.memory_space<vmem>>, vector<1x128xf32>
    %9 = vector.broadcast %8 : vector<1x128xf32> to vector<8x128xf32>
    %10 = arith.addf %7, %9 : vector<8x128xf32>
    %c0_9 = arith.constant 0 : index
    %c0_10 = arith.constant 0 : index
    %11 = vector.load %arg7[%c0_9, %c0_10] : memref<8x128xf32, #tpu.memory_space<vmem>>, vector<8x128xf32>
    tpu.vector_store %arg7[%c0_9, %c0_10], %10 {strides = array<i32>} : memref<8x128xf32, #tpu.memory_space<vmem>>, vector<8x128xf32>,
    return
  }
  func.func @transform_0(%arg0: i32, %arg1: i32) -> (i32, i32) {
    %c0_i32 = arith.constant 0 : i32
    %c0_i32_0 = arith.constant 0 : i32
    return %arg0, %c0_i32 : i32, i32
  }
  func.func @transform_1(%arg0: i32, %arg1: i32) -> (i32, i32) {
    %c0_i32 = arith.constant 0 : i32
    %c0_i32_0 = arith.constant 0 : i32
    return %arg1, %c0_i32 : i32, i32
  }
  func.func @transform_2(%arg0: i32, %arg1: i32) -> (i32, i32) {
    %c0_i32 = arith.constant 0 : i32
    %c0_i32_0 = arith.constant 0 : i32
    return %arg1, %c0_i32 : i32, i32
  }
  func.func @transform_3(%arg0: i32, %arg1: i32) -> (i32, i32) {
    %c0_i32 = arith.constant 0 : i32
    %c0_i32_0 = arith.constant 0 : i32
    %c0_i32_1 = arith.constant 0 : i32
    return %c0_i32, %c0_i32_0 : i32, i32
  }
  func.func @transform_4(%arg0: i32, %arg1: i32) -> (i32, i32) {
    %c0_i32 = arith.constant 0 : i32
    %c0_i32_0 = arith.constant 0 : i32
    return %c0_i32, %arg1 : i32, i32
  }
  func.func @transform_5(%arg0: i32, %arg1: i32) -> (i32, i32) {
    %c0_i32 = arith.constant 0 : i32
    return %arg0, %arg1 : i32, i32
  }
}

</mosaic_0001>

<bundles_post_ra>
// kernel: tpu_custom_call.1
= control target key start
LH: loop header
LB: loop body
LE: loop exit
PB: predicated region body
PF: predicated region fallthrough
CT: control target
= control target key end

     0   :  { %10 = vsyncpa [#allocation3], 0  ;;  %s516_s0 = inlined_call_operand.hbm [shape: bf16[8,128], index: 0, kind: input, shape index: {}]   ;;  %s517_s1 = inlined_call_operand.hbm [shape: bf16[128,128], index: 1, kind: input, shape index: {}]   ;;  %s518_s2 = inlined_call_operand.hbm [shape: bf16[128,128], index: 2, kind: input, shape index: {}]   ;;  %s519_s3 = inlined_call_operand.vmem [shape: bf16[1,128], index: 3, kind: input, shape index: {}]   ;;  %s520_s4 = inlined_call_operand.vmem [shape: f32[1,128], index: 4, kind: input, shape index: {}]   ;;  %s521_s5 = inlined_call_operand.hbm [shape: f32[8,128], index: 5, kind: output, shape index: {}]  }
   0x1   :  { %11 = vsyncpa [#allocation6], 0 }
   0x2   :  { %12 = vsyncpa [#allocation4], 0  ;;  %s391_s18 = smov [#allocation5]   ;;  %s297_s22 = scalar_lea.hbm %s517_s1, 1024 }
   0x3   :  { %s28_s19 = sshll.u32 %s391_s18, 4  ;;  %p298_p0 = scmp.ne.s32.totalorder %s517_s1, %s297_s22  ;;  %s29_s19 = int_to_ptr.vmem [resolvable:$true] %s28_s19 }
   0x4   :  { %p301_p1 = scmp.lt.u32.totalorder %s297_s22, %s517_s1 }
   0x6   :  { %p303_p2 = pnand %p301_p1, %p298_p0 }
   0x8   :  { %306 = shalt.err (!%p303_p2)
}
   0x9   :  { %s307_s27 = scalar_lea.vmem %s29_s19, 1024  ;;  %p312_p4 = scmp.lt.s32.totalorder %s29_s19, %s29_s19 }
   0xa   :  { %p308_p3 = scmp.ne.s32.totalorder %s29_s19, %s307_s27  ;;  %p313_p5 = scmp.lt.s32.totalorder %s307_s27, %s307_s27 }
   0xc   :  { %p314_p6 = por %p313_p5, %p312_p4 }
   0xe   :  { %p315_p7 = pnand %p314_p6, %p308_p3 }
  0x10   :  { %318 = shalt.err (!%p315_p7)
}
  0x11   :  { %s392_s28 = smov 64   ;;  %s393_s29 = smov 4  }
  0x12   :  { %34 = dma.hbm_to_vmem [thread:$0]  %s517_s1, 1024, %s29_s19, [#allocation6], %s392_s28, %s392_s28, %s393_s29  }
  0x13   :  { %s394_s7 = smov [#allocation2]   ;;  %s395_s9 = smov [#allocation7]  }
  0x14   :  { %s19_s8 = sshll.u32 %s394_s7, 4  ;;  %s40_s10 = sshll.u32 %s395_s9, 4  ;;  %s20_s8 = int_to_ptr.vmem [resolvable:$true] %s19_s8  ;;  %s41_s10 = int_to_ptr.vmem [resolvable:$true] %s40_s10 }
  0x15   :  { %s319_s13 = scalar_lea.hbm %s516_s0, 64 }
  0x16   :  { %p320_p8 = scmp.ne.s32.totalorder %s516_s0, %s319_s13  ;;  %p323_p9 = scmp.lt.u32.totalorder %s319_s13, %s516_s0 }
  0x18   :  { %p325_p10 = pnand %p323_p9, %p320_p8 }
  0x1a   :  { %328 = shalt.err (!%p325_p10)
}
  0x1b   :  { %s329_s1 = scalar_lea.vmem %s20_s8, 64  ;;  %p334_p12 = scmp.lt.s32.totalorder %s20_s8, %s20_s8 }
  0x1c   :  { %p330_p11 = scmp.ne.s32.totalorder %s20_s8, %s329_s1  ;;  %p335_p13 = scmp.lt.s32.totalorder %s329_s1, %s329_s1 }
  0x1e   :  { %p336_p0 = por %p335_p13, %p334_p12 }
  0x20   :  { %p337_p1 = pnand %p336_p0, %p330_p11 }
  0x22   :  { %340 = shalt.err (!%p337_p1)
}
  0x23   :  { %22 = dma.hbm_to_vmem [thread:$0]  %s516_s0, 64, %s20_s8, [#allocation3]  }
  0x24   :  { %s341_s22 = scalar_lea.hbm %s518_s2, 1024 }
  0x25   :  { %p342_p2 = scmp.ne.s32.totalorder %s518_s2, %s341_s22  ;;  %p345_p3 = scmp.lt.u32.totalorder %s341_s22, %s518_s2 }
  0x27   :  { %p347_p4 = pnand %p345_p3, %p342_p2 }
  0x29   :  { %350 = shalt.err (!%p347_p4)
}
  0x2a   :  { %s351_s27 = scalar_lea.vmem %s41_s10, 1024  ;;  %p356_p6 = scmp.lt.s32.totalorder %s41_s10, %s41_s10 }
  0x2b   :  { %p352_p5 = scmp.ne.s32.totalorder %s41_s10, %s351_s27  ;;  %p357_p7 = scmp.lt.s32.totalorder %s351_s27, %s351_s27 }
  0x2d   :  { %p358_p8 = por %p357_p7, %p356_p6 }
  0x2f   :  { %p359_p9 = pnand %p358_p8, %p352_p5 }
  0x31   :  { %362 = shalt.err (!%p359_p9)
}
  0x32   :  { %46 = dma.hbm_to_vmem [thread:$0]  %s518_s2, 1024, %s41_s10, [#allocation6], %s392_s28, %s392_s28, %s393_s29  }
  0x33   :  { %385 = dma.done.wait [#allocation3], 64  }
  0x34   :  { %386 = vsyncadd [#allocation3], 4294967232 }
  0x35   :  { %387 = dma.done.wait [#allocation6], 2048  }
  0x36   :  { %388 = vsyncadd [#allocation6], 4294965248  ;;  %v97_v0 = vlaneseq  ;;  %v396_v1 = vmov 0.0   ;;  %vm397_vm0 = vmmov 0   ;;  %v93_v4 = vld [vmem:[%s519_s3] sm:$0x1] }
  0x37   :  { %269 = vmatprep.subr.bf16.mxu0 %v396_v1  ;;  %285 = vmatprep.mubr.msk.bf16.mxu0 %vm397_vm0, %v396_v1  ;;  %v95_v5 = vpack.i.b16 %v93_v4, %v93_v4  ;;  %v77_v7 = vld [vmem:[#allocation7] sm:$0xf]  ;;  %v78_v8 = vld [vmem:[#allocation7 + $0x4] sm:$0xf]  ;;  %v79_v12 = vld [vmem:[#allocation7 + $0x8] sm:$0xf] }
  0x38   :  { %v98_v2 = vshrl.u32 %v97_v0, 7  ;;  %v61_v9 = vld [vmem:[#allocation5] sm:$0xf]  ;;  %v62_v11 = vld [vmem:[#allocation5 + $0x4] sm:$0xf]  ;;  %s398_s28 = smov [#allocation8]  }
  0x39   :  { %v80_v13 = vld [vmem:[#allocation7 + $0xc] sm:$0xf]  ;;  %v63_v20 = vld [vmem:[#allocation5 + $0x8] sm:$0xf]  ;;  %v81_v25 = vld [vmem:[#allocation7 + $0x10] sm:$0xf] }
  0x3a   :  { %v99_v3 = vsub.s32 0, %v98_v2  ;;  %v64_v21 = vld [vmem:[#allocation5 + $0xc] sm:$0xf]  ;;  %v82_v26 = vld [vmem:[#allocation7 + $0x14] sm:$0xf]  ;;  %s240_s29 = sshll.u32 %s398_s28, 4  ;;  %s241_s29 = int_to_ptr.vmem [resolvable:$true] %s240_s29 }
  0x3b   :  { %v65_v30 = vld [vmem:[#allocation5 + $0x10] sm:$0xf]  ;;  %v66_v31 = vld [vmem:[#allocation5 + $0x14] sm:$0xf]  ;;  %v83_v34 = vld [vmem:[#allocation7 + $0x18] sm:$0xf]  ;;  %p368_p11 = scmp.lt.s32.totalorder %s241_s29, %s241_s29 }
  0x3c   :  { %v100_v6 = vrot.slane %v95_v5, %v99_v3  ;;  %v84_v35 = vld [vmem:[#allocation7 + $0x1c] sm:$0xf]  ;;  %v67_v39 = vld [vmem:[#allocation5 + $0x18] sm:$0xf]  ;;  %v85_v43 = vld [vmem:[#allocation7 + $0x20] sm:$0xf] }
  0x3d   :  { %v68_v40 = vld [vmem:[#allocation5 + $0x1c] sm:$0xf]  ;;  %v86_v44 = vld [vmem:[#allocation7 + $0x24] sm:$0xf]  ;;  %v69_v48 = vld [vmem:[#allocation5 + $0x20] sm:$0xf] }
  0x3e   :  { %v476_v10 = vcombine.low %v100_v6, %v100_v6  ;;  %v70_v49 = vld [vmem:[#allocation5 + $0x24] sm:$0xf]  ;;  %v87_v52 = vld [vmem:[#allocation7 + $0x28] sm:$0xf]  ;;  %v88_v53 = vld [vmem:[#allocation7 + $0x2c] sm:$0xf] }
  0x3f   :  { %v71_v57 = vld [vmem:[#allocation5 + $0x28] sm:$0xf]  ;;  %v72_v58 = vld [vmem:[#allocation5 + $0x2c] sm:$0xf]  ;;  %v89_v61 = vld [vmem:[#allocation7 + $0x30] sm:$0xf] }
  0x40   :  { %v105_v14 = vmul.bf16 %v476_v10, %v77_v7  ;;  %v106_v15 = vmul.bf16 %v476_v10, %v78_v8  ;;  %v107_v18 = vmul.bf16 %v476_v10, %v79_v12  ;;  %v108_v19 = vmul.bf16 %v476_v10, %v80_v13  ;;  %v90_v62 = vld [vmem:[#allocation7 + $0x34] sm:$0xf]  ;;  %v73_v3 = vld [vmem:[#allocation5 + $0x30] sm:$0xf]  ;;  %v91_v7 = vld [vmem:[#allocation7 + $0x38] sm:$0xf] }
  0x41   :  { %v109_v28 = vmul.bf16 %v476_v10, %v81_v25  ;;  %v110_v29 = vmul.bf16 %v476_v10, %v82_v26  ;;  %v111_v37 = vmul.bf16 %v476_v10, %v83_v34  ;;  %v112_v38 = vmul.bf16 %v476_v10, %v84_v35  ;;  %v74_v4 = vld [vmem:[#allocation5 + $0x34] sm:$0xf]  ;;  %v92_v8 = vld [vmem:[#allocation7 + $0x3c] sm:$0xf]  ;;  %v75_v13 = vld [vmem:[#allocation5 + $0x38] sm:$0xf] }
  0x42   :  { %v121_v16 = vadd.bf16 %v105_v14, %v61_v9  ;;  %v122_v17 = vadd.bf16 %v106_v15, %v62_v11  ;;  %v123_v23 = vadd.bf16 %v107_v18, %v63_v20  ;;  %v124_v24 = vadd.bf16 %v108_v19, %v64_v21  ;;  %v76_v14 = vld [vmem:[#allocation5 + $0x3c] sm:$0xf]  ;;  %s363_s8 = scalar_lea.vmem %s241_s29, 128 }
  0x43   :  { %v125_v32 = vadd.bf16 %v109_v28, %v65_v30  ;;  %v126_v33 = vadd.bf16 %v110_v29, %v66_v31  ;;  %v127_v41 = vadd.bf16 %v111_v37, %v67_v39  ;;  %v128_v42 = vadd.bf16 %v112_v38, %v68_v40  ;;  %v137_v18 = vld [vmem:[#allocation2] sm:$0xf]  ;;  %p364_p10 = scmp.ne.s32.totalorder %s241_s29, %s363_s8  ;;  %p369_p12 = scmp.lt.s32.totalorder %s363_s8, %s363_s8 }
  0x44   :  { %v252_v22 = vcombine.low %v121_v16, %v122_v17  ;;  %v253_v27 = vcombine.low %v123_v23, %v124_v24  ;;  %v113_v46 = vmul.bf16 %v476_v10, %v85_v43  ;;  %v114_v47 = vmul.bf16 %v476_v10, %v86_v44  ;;  %v251_v19 = vld [vmem:[%s520_s4] ss:$0 sm:$0xff] }
  0x45   :  { %v254_v36 = vcombine.low %v125_v32, %v126_v33  ;;  %v255_v45 = vcombine.low %v127_v41, %v128_v42  ;;  %v115_v55 = vmul.bf16 %v476_v10, %v87_v52  ;;  %v116_v56 = vmul.bf16 %v476_v10, %v88_v53  ;;  %p370_p13 = por %p369_p12, %p368_p11 }
  0x46   :  { %270 = vmatpush3.bf16.xpose.msra.mxu0 %v252_v22  ;;  %v129_v50 = vadd.bf16 %v113_v46, %v69_v48  ;;  %v130_v51 = vadd.bf16 %v114_v47, %v70_v49  ;;  %v117_v0 = vmul.bf16 %v476_v10, %v89_v61  ;;  %v118_v2 = vmul.bf16 %v476_v10, %v90_v62 }
  0x47   :  { %271 = vmatprep.subr.bf16.mxu0 %v396_v1  ;;  %v131_v59 = vadd.bf16 %v115_v55, %v71_v57  ;;  %v132_v60 = vadd.bf16 %v116_v56, %v72_v58  ;;  %v119_v11 = vmul.bf16 %v476_v10, %v91_v7  ;;  %v120_v12 = vmul.bf16 %v476_v10, %v92_v8  ;;  %p371_p0 = pnand %p370_p13, %p364_p10 }
  0x48   :  { %v256_v54 = vcombine.low %v129_v50, %v130_v51  ;;  %v133_v5 = vadd.bf16 %v117_v0, %v73_v3  ;;  %v134_v6 = vadd.bf16 %v118_v2, %v74_v4 }
  0x49   :  { %v257_v63 = vcombine.low %v131_v59, %v132_v60  ;;  %v135_v15 = vadd.bf16 %v119_v11, %v75_v13  ;;  %v136_v16 = vadd.bf16 %v120_v12, %v76_v14 }
  0x4a   :  { %v258_v9 = vcombine.low %v133_v5, %v134_v6 }
  0x4b   :  { %v259_v17 = vcombine.low %v135_v15, %v136_v16 }
  0x4e   :  { %272 = vmatpush3.bf16.xpose.msra.mxu0 %v253_v27 }
  0x4f   :  { %273 = vmatprep.subr.bf16.mxu0 %v396_v1 }
  0x56   :  { %274 = vmatpush3.bf16.xpose.msra.mxu0 %v254_v36 }
  0x57   :  { %275 = vmatprep.subr.bf16.mxu0 %v396_v1 }
  0x5e   :  { %276 = vmatpush3.bf16.xpose.msra.mxu0 %v255_v45 }
  0x5f   :  { %277 = vmatprep.subr.bf16.mxu0 %v396_v1 }
  0x66   :  { %278 = vmatpush3.bf16.xpose.msra.mxu0 %v256_v54 }
  0x67   :  { %279 = vmatprep.subr.bf16.mxu0 %v396_v1 }
  0x6e   :  { %280 = vmatpush3.bf16.xpose.msra.mxu0 %v257_v63 }
  0x6f   :  { %281 = vmatprep.subr.bf16.mxu0 %v396_v1 }
  0x76   :  { %282 = vmatpush3.bf16.xpose.msra.mxu0 %v258_v9 }
  0x77   :  { %283 = vmatprep.subr.bf16.mxu0 %v396_v1 }
  0x7e   :  { %284 = vmatpush3.bf16.xpose.msra.mxu0 %v259_v17 }
  0x85   :  { %286 = vmatmul.mubr.bf16.vlgmr.msra.gmra.mrb[0].mxu0 %v137_v18 }
 0x158   :  { %v227_v20 = vpop.f32.mrb[0].mxu0 }
 0x159   :  { %v228_v21 = vadd.f32 %v251_v19, %v227_v20  ;;  %v287_v10 = vpop.f32.mrb[1].mxu0 }
 0x15a   :  { %v230_v22 = vpop.f32.mrb[2].mxu0 }
 0x15b   :  { %233 = vst [vmem:[#allocation8] sm:$0xff] %v228_v21  ;;  %v288_v23 = vpop.f32.mrb[3].mxu0 }
 0x15c   :  { %374 = shalt.err (!%p371_p0)
}
 0x15d   :  { %s375_s4 = scalar_lea.hbm %s521_s5, 128 }
 0x15e   :  { %p376_p1 = scmp.ne.s32.totalorder %s521_s5, %s375_s4  ;;  %p379_p2 = scmp.lt.u32.totalorder %s375_s4, %s521_s5 }
 0x160   :  { %p381_p3 = pnand %p379_p2, %p376_p1 }
 0x162   :  { %384 = shalt.err (!%p381_p3)
}
 0x163   :  { %243 = dma.vmem_to_hbm [thread:$0]  %s241_s29, 128, %s521_s5, [#allocation4]  }
 0x164   :  { %389 = dma.done.wait [#allocation4], 128  }
 0x165   :  { %390 = vsyncadd [#allocation4], 4294967168 }
 0x166   :  { %247 = vsyncpa [#allocation3], 1 }
 0x167   :  { %248 = vsyncpa [#allocation6], 1 }
 0x168   :  { %249 = vsyncpa [#allocation4], 1 }

</bundles_post_ra>
